<compile_context>
chip_gen: v5e
topology: v5e:2x2
jax: 0.10.0
libtpu: 0.0.40
codegen_flags: <defaults>
</compile_context>

<pallas_src>
import jax
import jax.numpy as jnp
from jax import lax
from jax.experimental import pallas as pl
from jax.experimental.pallas import tpu as pltpu


_RING = 8     # in-flight row DMAs per core (semaphore ring depth)
_CHUNK = 256  # update rows handled per grid step


def _index_put_scatter_kernel(idx_ref, src_ref, inp_hbm, value_hbm, out_hbm, sems):
    # idx_ref  : SMEM int32 [M]   destination row per update (wrapped/clamped)
    # src_ref  : SMEM int32 [M]   source row in `value` (last-occurrence redirect)
    # inp_hbm  : HBM ref aliased to out_hbm; never touched here -- its rows ARE
    #            the output for all non-updated rows.
    # value_hbm: HBM f32 [M, C]
    # out_hbm  : HBM f32 [N, C]
    # sems     : DMA semaphore ring [_RING]
    del inp_hbm
    m_total = idx_ref.shape[0]                      # static
    base = pl.program_id(0) * _CHUNK                # first row of this chunk
    count = jnp.minimum(_CHUNK, m_total - base)     # rows handled by this chunk

    def start_row(j, slot):
        pltpu.make_async_copy(
            value_hbm.at[src_ref[base + j]],
            out_hbm.at[idx_ref[base + j]],
            sems.at[slot],
        ).start()

    def wait_slot(slot):
        # Descriptor only needs matching transfer size for the wait.
        pltpu.make_async_copy(
            value_hbm.at[0], out_hbm.at[0], sems.at[slot]
        ).wait()

    def body(j, carry):
        slot = j % _RING

        @pl.when(j >= _RING)
        def _():
            wait_slot(slot)          # free this slot before reusing it
        start_row(j, slot)
        return carry

    lax.fori_loop(0, count, body, 0)

    # Drain: the last min(count, _RING) copies are still in flight, exactly one
    # per slot 0..min(count,_RING)-1.
    def drain(j, carry):
        wait_slot(j)
        return carry

    lax.fori_loop(0, jnp.minimum(count, _RING), drain, 0)


def index_put_2d(inp, index, value):
    """Pallas equivalent of aten.index_put(input, (index,), value, accumulate=False).

    For a fully in-place update, donate `inp` (jax.jit(..., donate_argnums));
    otherwise XLA materializes one defensive clone of `inp` before the kernel.
    """
    n, c = inp.shape
    m, cv = value.shape
    assert cv == c and index.shape == (m,)
    assert n < 2**31 and m < 2**31, "row indices must fit in int32"

    if m == 0:
        return inp

    # PyTorch wraps negative indices; out-of-range indices raise there, but a
    # DMA has no runtime bounds check, so wrap once then clamp.
    # TODO(synk): out-of-range indices are clamped instead of raising an error.
    idx = index.astype(jnp.int32)
    idx = jnp.where(idx < 0, idx + n, idx)
    idx = jnp.clip(idx, 0, n - 1)

    # Last-write-wins dedup redirect: src[i] = position of the LAST update that
    # targets row idx[i].  All copies to a given destination then carry
    # identical bytes, so concurrent / out-of-order DMAs (and the "parallel"
    # chunk axis on v7x) cannot change the result.
    order = jnp.arange(m, dtype=jnp.int32)
    last_of_dest = jnp.full((n,), -1, dtype=jnp.int32).at[idx].max(order)
    src = last_of_dest[idx]

    num_chunks = pl.cdiv(m, _CHUNK)

    grid_spec = pltpu.PrefetchScalarGridSpec(
        # idx/src land in SMEM before the grid runs and drive the row DMAs.
        # TODO(synk): for M >~ 100K the 1-D SMEM padding (next_pow2(4M) bytes
        # per array) risks SMEM overflow; keep them in HBM and DMA per-chunk
        # slices into an SMEM scratch instead.
        num_scalar_prefetch=2,
        grid=(num_chunks,),
        in_specs=[
            pl.BlockSpec(memory_space=pl.ANY),   # input: aliased to the output
            pl.BlockSpec(memory_space=pl.ANY),   # value rows: stay in HBM
        ],
        out_specs=pl.BlockSpec(memory_space=pl.ANY),
        scratch_shapes=[pltpu.SemaphoreType.DMA((_RING,))],
    )

    return pl.pallas_call(
        _index_put_scatter_kernel,
        out_shape=jax.ShapeDtypeStruct((n, c), inp.dtype),
        grid_spec=grid_spec,
        # Positional call args are (idx, src, inp, value); index 2 = inp
        # (aliases are numbered including the scalar-prefetch operands, as
        # validated by the previous working version).
        input_output_aliases={2: 0},
        compiler_params=pltpu.CompilerParams(
            # Chunks are independent after the dedup redirect -> let v7x's two
            # TensorCores split them; measured neutral on v5e/v6e.
            dimension_semantics=("parallel",),
        ),
    )(idx, src, inp, value)


if __name__ == "__main__":
    key = jax.random.PRNGKey(0)
    k_inp, k_val, k_idx = jax.random.split(key, 3)

    N, C, M = 16, 128, 8
    inp = jax.random.normal(k_inp, (N, C), dtype=jnp.float32)
    value = jax.random.normal(k_val, (M, C), dtype=jnp.float32)

    # --- Test 1: unique target rows, half of them negative (PyTorch wrapping).
    rows = jax.random.permutation(k_idx, N)[:M].astype(jnp.int32)
    index = jnp.where(jnp.arange(M) % 2 == 0, rows - N, rows)

    inp_snapshot = jax.device_get(inp)   # verify functional (non-mutating) semantics

    out = jax.block_until_ready(index_put_2d(inp, index, value))

    wrapped = jnp.where(index < 0, index + N, index)
    ref = inp.at[wrapped].set(value)
    assert jnp.allclose(out, ref), "mismatch vs reference (unique indices)"
    assert jnp.allclose(inp, inp_snapshot), "input was mutated"

    # --- Test 2: duplicate target rows -> last occurrence must win.
    dup_list = [3, 5, 3, 7, 5, 3, 1, 0]
    index_dup = jnp.array(dup_list, dtype=jnp.int32)
    out_dup = jax.block_until_ready(index_put_2d(inp, index_dup, value))
    ref_dup = inp
    for i, r in enumerate(dup_list):
        ref_dup = ref_dup.at[r].set(value[i])
    assert jnp.allclose(out_dup, ref_dup), "mismatch vs reference (duplicate indices)"

    print("KERNEL_OK")
</pallas_src>

<mosaic_0001>
module attributes {stable_mosaic.version = 11 : i64} {
  func.func @_index_put_scatter_kernel(%arg0: i32, %arg1: memref<8xi32, #tpu.memory_space<smem>>, %arg2: memref<8xi32, #tpu.memory_space<smem>>, %arg3: memref<16x128xf32, #tpu.memory_space<any>>, %arg4: memref<8x128xf32, #tpu.memory_space<any>>, %arg5: memref<16x128xf32, #tpu.memory_space<any>>, %arg6: memref<8x!tpu.dma_semaphore, #tpu.memory_space<semaphore_mem>>) attributes {dimension_semantics = [#tpu.dimension_semantics<parallel>], iteration_bounds = array<i64: 1>, scalar_prefetch = 2 : i64, scratch_operands = 1 : i64, tpu.core_type = #tpu.core_type<tc>, window_params = [{}, {}, {}]} {
    %c256_i32 = arith.constant 256 : i32
    %0 = arith.muli %arg0, %c256_i32 : i32
    %c8_i32 = arith.constant 8 : i32
    %1 = arith.subi %c8_i32, %0 : i32
    %c256_i32_0 = arith.constant 256 : i32
    %2 = arith.minsi %c256_i32_0, %1 : i32
    %c0_i32 = arith.constant 0 : i32
    %c0_i32_1 = arith.constant 0 : i32
    %3 = arith.subi %2, %c0_i32_1 : i32
    %4 = arith.addi %c0_i32_1, %3 : i32
    %c1_i32 = arith.constant 1 : i32
    scf.for %arg7 = %c0_i32_1 to %4 step %c1_i32  : i32 {
      %c8_i32_6 = arith.constant 8 : i32
      %c0_i32_7 = arith.constant 0 : i32
      %8 = arith.cmpi eq, %c8_i32_6, %c0_i32_7 : i32
      %c1_i32_8 = arith.constant 1 : i32
      %9 = arith.select %8, %c1_i32_8, %c8_i32_6 : i32
      %10 = arith.remsi %arg7, %9 : i32
      %c0_i32_9 = arith.constant 0 : i32
      %11 = arith.cmpi ne, %10, %c0_i32_9 : i32
      %c0_i32_10 = arith.constant 0 : i32
      %12 = arith.cmpi slt, %10, %c0_i32_10 : i32
      %c0_i32_11 = arith.constant 0 : i32
      %13 = arith.cmpi slt, %9, %c0_i32_11 : i32
      %14 = arith.xori %12, %13 : i1
      %15 = arith.andi %14, %11 : i1
      %16 = arith.addi %10, %9 : i32
      %17 = arith.select %15, %16, %10 : i32
      %c8_i32_12 = arith.constant 8 : i32
      %18 = arith.cmpi sge, %arg7, %c8_i32_12 : i32
      %19 = arith.extui %18 : i1 to i32
      %c0_i32_13 = arith.constant 0 : i32
      %20 = arith.cmpi ne, %19, %c0_i32_13 : i32
      scf.if %20 {
        %c0_i32_16 = arith.constant 0 : i32
        %c0_i32_17 = arith.constant 0 : i32
        %c0_i32_18 = arith.constant 0 : i32
        %33 = tpu.memref_slice %arg4[%c0_i32_16, %c0_i32_18] : memref<8x128xf32, #tpu.memory_space<any>> -> memref<1x128xf32, #tpu.memory_space<any>>
        %34 = tpu.memref_squeeze %33 : memref<1x128xf32, #tpu.memory_space<any>> -> memref<128xf32, #tpu.memory_space<any>>
        %c0_i32_19 = arith.constant 0 : i32
        %35 = tpu.memref_slice %arg5[%c0_i32_17, %c0_i32_19] : memref<16x128xf32, #tpu.memory_space<any>> -> memref<1x128xf32, #tpu.memory_space<any>>
        %36 = tpu.memref_squeeze %35 : memref<1x128xf32, #tpu.memory_space<any>> -> memref<128xf32, #tpu.memory_space<any>>
        %37 = tpu.memref_slice %arg6[%17] : memref<8x!tpu.dma_semaphore, #tpu.memory_space<semaphore_mem>> -> memref<1x!tpu.dma_semaphore, #tpu.memory_space<semaphore_mem>>
        %38 = tpu.memref_squeeze %37 : memref<1x!tpu.dma_semaphore, #tpu.memory_space<semaphore_mem>> -> memref<!tpu.dma_semaphore, #tpu.memory_space<semaphore_mem>>
        tpu.wait_dma2 semaphore(%38 : memref<!tpu.dma_semaphore, #tpu.memory_space<semaphore_mem>>) src(%34 : memref<128xf32, #tpu.memory_space<any>>) dst(%36 : memref<128xf32, #tpu.memory_space<any>>)
      } else {
      }
      %21 = arith.addi %0, %arg7 : i32
      %22 = arith.index_cast %21 : i32 to index
      %23 = memref.load %arg2[%22] : memref<8xi32, #tpu.memory_space<smem>>
      %24 = arith.addi %0, %arg7 : i32
      %25 = arith.index_cast %24 : i32 to index
      %26 = memref.load %arg1[%25] : memref<8xi32, #tpu.memory_space<smem>>
      %c0_i32_14 = arith.constant 0 : i32
      %27 = tpu.memref_slice %arg4[%23, %c0_i32_14] : memref<8x128xf32, #tpu.memory_space<any>> -> memref<1x128xf32, #tpu.memory_space<any>>
      %28 = tpu.memref_squeeze %27 : memref<1x128xf32, #tpu.memory_space<any>> -> memref<128xf32, #tpu.memory_space<any>>
      %c0_i32_15 = arith.constant 0 : i32
      %29 = tpu.memref_slice %arg5[%26, %c0_i32_15] : memref<16x128xf32, #tpu.memory_space<any>> -> memref<1x128xf32, #tpu.memory_space<any>>
      %30 = tpu.memref_squeeze %29 : memref<1x128xf32, #tpu.memory_space<any>> -> memref<128xf32, #tpu.memory_space<any>>
      %31 = tpu.memref_slice %arg6[%17] : memref<8x!tpu.dma_semaphore, #tpu.memory_space<semaphore_mem>> -> memref<1x!tpu.dma_semaphore, #tpu.memory_space<semaphore_mem>>
      %32 = tpu.memref_squeeze %31 : memref<1x!tpu.dma_semaphore, #tpu.memory_space<semaphore_mem>> -> memref<!tpu.dma_semaphore, #tpu.memory_space<semaphore_mem>>
      tpu.enqueue_dma source(%28 : memref<128xf32, #tpu.memory_space<any>>) target(%30 : memref<128xf32, #tpu.memory_space<any>>) target_semaphore(%32 : memref<!tpu.dma_semaphore, #tpu.memory_space<semaphore_mem>>)
    }
    %c8_i32_2 = arith.constant 8 : i32
    %5 = arith.minsi %2, %c8_i32_2 : i32
    %c0_i32_3 = arith.constant 0 : i32
    %c0_i32_4 = arith.constant 0 : i32
    %6 = arith.subi %5, %c0_i32_4 : i32
    %7 = arith.addi %c0_i32_4, %6 : i32
    %c1_i32_5 = arith.constant 1 : i32
    scf.for %arg7 = %c0_i32_4 to %7 step %c1_i32_5  : i32 {
      %c0_i32_6 = arith.constant 0 : i32
      %c0_i32_7 = arith.constant 0 : i32
      %c0_i32_8 = arith.constant 0 : i32
      %8 = tpu.memref_slice %arg4[%c0_i32_6, %c0_i32_8] : memref<8x128xf32, #tpu.memory_space<any>> -> memref<1x128xf32, #tpu.memory_space<any>>
      %9 = tpu.memref_squeeze %8 : memref<1x128xf32, #tpu.memory_space<any>> -> memref<128xf32, #tpu.memory_space<any>>
      %c0_i32_9 = arith.constant 0 : i32
      %10 = tpu.memref_slice %arg5[%c0_i32_7, %c0_i32_9] : memref<16x128xf32, #tpu.memory_space<any>> -> memref<1x128xf32, #tpu.memory_space<any>>
      %11 = tpu.memref_squeeze %10 : memref<1x128xf32, #tpu.memory_space<any>> -> memref<128xf32, #tpu.memory_space<any>>
      %12 = tpu.memref_slice %arg6[%arg7] : memref<8x!tpu.dma_semaphore, #tpu.memory_space<semaphore_mem>> -> memref<1x!tpu.dma_semaphore, #tpu.memory_space<semaphore_mem>>
      %13 = tpu.memref_squeeze %12 : memref<1x!tpu.dma_semaphore, #tpu.memory_space<semaphore_mem>> -> memref<!tpu.dma_semaphore, #tpu.memory_space<semaphore_mem>>
      tpu.wait_dma2 semaphore(%13 : memref<!tpu.dma_semaphore, #tpu.memory_space<semaphore_mem>>) src(%9 : memref<128xf32, #tpu.memory_space<any>>) dst(%11 : memref<128xf32, #tpu.memory_space<any>>)
    }
    return
  }
}

</mosaic_0001>

<bundles_post_ra>
// kernel: tpu_custom_call.1
= control target key start
LH: loop header
LB: loop body
LE: loop exit
PB: predicated region body
PF: predicated region fallthrough
CT: control target
= control target key end

     0   :  { %s256_s2 = smov [#allocation4]   ;;  %s257_s21 = smov [#allocation5]   ;;  %s326_s0 = inlined_call_operand.vmem [shape: s32[8], index: 0, kind: input, shape index: {}]   ;;  %s327_s2 = inlined_call_operand.hbm [shape: f32[16,128], index: 2, kind: input, shape index: {}, may-alias: {2,4}]   ;;  %s328_s3 = inlined_call_operand.vmem [shape: f32[8,128], index: 3, kind: input, shape index: {}]   ;;  %s329_s4 = inlined_call_operand.hbm [shape: f32[16,128], index: 4, kind: output, shape index: {}, may-alias: {2,4}]   ;;  %s330_s1 = inlined_call_operand.vmem [shape: s32[8], index: 1, kind: input, shape index: {}]  }
   0x1   :  { %s10_s17 = sshll.u32 %s326_s0, 4  ;;  %s15_s20 = sshll.u32 %s330_s1, 4  ;;  %s11_s17 = int_to_ptr.vmem [resolvable:$true] %s10_s17  ;;  %s16_s20 = int_to_ptr.vmem [resolvable:$true] %s15_s20 }
   0x2   :  { %13 = dma.vmem_to_smem %s11_s17, 16, %s256_s2, [#allocation3] }
   0x3   :  { %18 = dma.vmem_to_smem %s16_s20, 16, %s257_s21, [#allocation3] }
   0x4   :  { %240 = dma.done.wait [#allocation3], 32 }
   0x5   :  { %241 = vsyncadd [#allocation3], 4294967264 }
   0x6   :  { %21 = sfence }
   0x7   :  { %s289_s22 = smov 0  }
   0x8 LB: > { %p32_p0 = scmp.lt.s32.totalorder %s250_s22, 0  ;;  %s33_s0 = ssub.s32 0, %s250_s22  ;;  %s250_s22 = sphi %s289_s22, %s29_s22  }
   0x9   : > { %s151_s1 = smin.u32 %s250_s22, %s33_s0  ;;  %p165_p1 = scmp.ge.s32.totalorder %s250_s22, 8 }
   0xa   : > { %s35_s23 = sand.u32 7, %s151_s1  }
   0xb   : > { %s36_s24 = ssub.s32 0, %s35_s23 }
   0xc   : > { %s332_s24 = smov (!%p32_p0, %s36_s24), %s35_s23 }
   0xd   : > { %p153_p2 = scmp.lt.s32.totalorder %s332_s24, 0  ;;  %s42_s25 = sadd.s32 8, %s332_s24 }
   0xf   : > { %s334_s25 = smov (!%p153_p2, %s42_s25), %s332_s24 }
  0x10   : > { %s298_s26 = scalar_lea.sflag [#allocation2], %s334_s25 }
  0x11   : > { %243 = dma.done.wait (%p165_p1), %s298_s26, 16 }
  0x12   : > { %245 = vsyncadd (%p165_p1), %s298_s26, 4294967280  ;;  %s52_s27 = sld [smem:[#allocation5 + %s250_s22]]  ;;  %s212_s15 = scalar_lea.vmem %s328_s3, 8 }
  0x13   : > { %s53_s28 = sld [smem:[#allocation4 + %s250_s22]] }
  0x18   : > { %s54_s5 = scalar_lea.vmem %s328_s3, %s52_s27 }
  0x19   : > { %s55_s8 = scalar_lea.hbm %s329_s4, %s53_s28  ;;  %s64_s9 = sshll.u32 %s54_s5, 4  ;;  %s65_s9 = int_to_ptr.vmem [resolvable:$true] %s64_s9 }
  0x1a   : > { %s66_s10 = sshll.u32 %s55_s8, 4  ;;  %s208_s11 = sshra.s32 %s65_s9, 4  ;;  %s67_s10 = int_to_ptr.hbm [resolvable:$true] %s66_s10  ;;  %s209_s11 = int_to_ptr.vmem [resolvable:$true] %s208_s11 }
  0x1b   : > { %s210_s12 = scalar_lea.vmem %s209_s11, 1  ;;  %p213_p4 = scmp.lt.s32.totalorder %s209_s11, %s328_s3 }
  0x1c   : > { %p211_p3 = scmp.ne.s32.totalorder %s209_s11, %s210_s12  ;;  %p214_p5 = scmp.lt.s32.totalorder %s212_s15, %s210_s12 }
  0x1e   : > { %p215_p6 = por %p214_p5, %p213_p4 }
  0x20   : > { %p216_p7 = pnand %p215_p6, %p211_p3 }
  0x22   : > { %219 = shalt.err (!%p216_p7)  }
  0x23   : > { %s220_s18 = sshra.s32 %s67_s10, 4  ;;  %s224_s21 = scalar_lea.hbm %s329_s4, 16  ;;  %s221_s18 = int_to_ptr.hbm [resolvable:$true] %s220_s18 }
  0x24   : > { %s222_s19 = scalar_lea.hbm %s221_s18, 1  ;;  %p225_p9 = scmp.lt.s32.totalorder %s221_s18, %s329_s4 }
  0x25   : > { %p223_p8 = scmp.ne.s32.totalorder %s221_s18, %s222_s19  ;;  %p226_p10 = scmp.lt.s32.totalorder %s224_s21, %s222_s19 }
  0x27   : > { %p227_p11 = por %p226_p10, %p225_p9 }
  0x29   : > { %p228_p12 = pnand %p227_p11, %p223_p8 }
  0x2b   : > { %231 = shalt.err (!%p228_p12)  }
  0x2c   : > { %69 = dma.vmem_to_hbm [thread:$0]  %s65_s9, 16, %s67_s10, %s298_s26 }
  0x2d   : > { %s29_s22 = sadd.s32 1, %s250_s22  }
  0x2e   : > { %p28_p13 = scmp.ge.s32.totalorder %s29_s22, 8 }
  0x2f   :  { %s252_s23 = smov (%p28_p13), 0  }
  0x30   :  { %31 = sbr.rel (!%p28_p13) target bundleno = 8 (0x8), region = 46 }
  0x35 LB: > { %s78_s24 = scalar_lea.sflag [#allocation2], %s254_s23  ;;  %s254_s23 = sphi %s252_s23, %s75_s23  }
  0x36   : > { %246 = dma.done.wait %s78_s24, 16 }
  0x37   : > { %247 = vsyncadd %s78_s24, 4294967280  ;;  %s75_s23 = sadd.s32 1, %s254_s23  }
  0x38   : > { %p74_p0 = scmp.ge.s32.totalorder %s75_s23, 8 }
  0x3a   :  { %77 = sbr.rel (!%p74_p0) target bundleno = 53 (0x35), region = 57 }
  0x3f   :  { %81 = vsyncmov [#allocation2] }
  0x42   :  { %s82_s25 = vpop.sfrf %81 }
  0x43   :  { %p155_p1 = scmp.ne.s32.totalorder %s82_s25, 0 }
  0x45   :  { %86 = shalt.err (%p155_p1)  }
  0x46   :  { %88 = vsyncmov [#allocation2 + $0x1] }
  0x49   :  { %s89_s26 = vpop.sfrf %88 }
  0x4a   :  { %p156_p2 = scmp.ne.s32.totalorder %s89_s26, 0 }
  0x4c   :  { %93 = shalt.err (%p156_p2)  }
  0x4d   :  { %95 = vsyncmov [#allocation2 + $0x2] }
  0x50   :  { %s96_s3 = vpop.sfrf %95 }
  0x51   :  { %p157_p3 = scmp.ne.s32.totalorder %s96_s3, 0 }
  0x53   :  { %100 = shalt.err (%p157_p3)  }
  0x54   :  { %102 = vsyncmov [#allocation2 + $0x3] }
  0x57   :  { %s103_s4 = vpop.sfrf %102 }
  0x58   :  { %p158_p4 = scmp.ne.s32.totalorder %s103_s4, 0 }
  0x5a   :  { %107 = shalt.err (%p158_p4)  }
  0x5b   :  { %109 = vsyncmov [#allocation2 + $0x4] }
  0x5e   :  { %s110_s22 = vpop.sfrf %109 }
  0x5f   :  { %p159_p5 = scmp.ne.s32.totalorder %s110_s22, 0 }
  0x61   :  { %114 = shalt.err (%p159_p5)  }
  0x62   :  { %116 = vsyncmov [#allocation2 + $0x5] }
  0x65   :  { %s117_s27 = vpop.sfrf %116 }
  0x66   :  { %p160_p6 = scmp.ne.s32.totalorder %s117_s27, 0 }
  0x68   :  { %121 = shalt.err (%p160_p6)  }
  0x69   :  { %123 = vsyncmov [#allocation2 + $0x6] }
  0x6c   :  { %s124_s28 = vpop.sfrf %123 }
  0x6d   :  { %p161_p7 = scmp.ne.s32.totalorder %s124_s28, 0 }
  0x6f   :  { %128 = shalt.err (%p161_p7)  }
  0x70   :  { %130 = vsyncmov [#allocation2 + $0x7] }
  0x73   :  { %s131_s29 = vpop.sfrf %130 }
  0x74   :  { %p162_p8 = scmp.ne.s32.totalorder %s131_s29, 0 }
  0x76   :  { %135 = shalt.err (%p162_p8)  }

</bundles_post_ra>
